<compile_context>
chip_gen: v7x
topology: tpu7x:2x2x1
jax: 0.10.0
libtpu: 0.0.40
codegen_flags: <defaults>
</compile_context>

<pallas_src>
import functools

import jax
import jax.numpy as jnp
from jax.experimental import pallas as pl
from jax.experimental.pallas import tpu as pltpu


def _round_up(x, m):
    return ((x + m - 1) // m) * m


def _mlp_kernel(x_ref,
                w1_ref, b1_ref,
                w2_ref, b2_ref,
                w3_ref, b3_ref,
                w4_ref, b4_ref,
                w5_ref, b5_ref,
                w6_ref, b6_ref,
                o_ref):
    """Fused forward for one batch tile: 5x (Linear + ReLU) + final Linear."""
    h = x_ref[...].astype(jnp.float32)

    def layer(h, w_ref, b_ref, relu):
        # Matmul operands in the weights' dtype (f32 or bf16); accumulate and
        # do bias-add / ReLU in f32 on the VPU (full 128-lane vregs).
        y = jnp.dot(h.astype(w_ref.dtype), w_ref[...],
                    preferred_element_type=jnp.float32) + b_ref[...]
        return jnp.maximum(y, 0.0) if relu else y
        # TODO(synk): training-mode dropout (stochastic mask via pltpu.prng_*)
        # is intentionally omitted; eval-mode dropout is the identity.

    h = layer(h, w1_ref, b1_ref, True)
    h = layer(h, w2_ref, b2_ref, True)
    h = layer(h, w3_ref, b3_ref, True)
    h = layer(h, w4_ref, b4_ref, True)
    h = layer(h, w5_ref, b5_ref, True)
    out = layer(h, w6_ref, b6_ref, False)
    o_ref[...] = out.astype(o_ref.dtype)


def prepare_params(params, compute_dtype=jnp.float32):
    """One-time prep (hoisted out of the forward hot path):
    transpose PyTorch-layout weights (out, in) -> (in, out), zero-pad every
    feature dim to a multiple of 128 lanes, and make biases 2D (1, out_pad).

    Use compute_dtype=jnp.bfloat16 on v6e/v7x for ~2x MXU throughput and half
    the DMA bytes; biases stay f32 (accumulation/elementwise is always f32).
    """
    flat = []
    for i in range(6):
        W = jnp.asarray(params[2 * i], jnp.float32)        # (out, in)
        b = jnp.asarray(params[2 * i + 1], jnp.float32)    # (out,)
        out_d, in_d = W.shape
        in_p = _round_up(in_d, 128)
        out_p = _round_up(out_d, 128)
        Wt = jnp.zeros((in_p, out_p), compute_dtype)
        Wt = Wt.at[:in_d, :out_d].set(W.T.astype(compute_dtype))
        bp = jnp.zeros((1, out_p), jnp.float32)
        bp = bp.at[0, :out_d].set(b)
        flat.append(Wt)
        flat.append(bp)
    return flat


@functools.partial(jax.jit, static_argnames=("num_out", "tile_b"))
def net1_forward(x, prepared, *, num_out, tile_b=512):
    """x: (batch, num_in) f32.  prepared: output of prepare_params()."""
    x = jnp.asarray(x, jnp.float32)
    batch, num_in = x.shape
    in_p = prepared[0].shape[0]     # padded input features
    out_p = prepared[-1].shape[1]   # padded output features

    # Batch tile: multiple of 8 sublanes; don't exceed the (rounded-up) batch.
    tb = min(tile_b, _round_up(batch, 8))
    batch_p = _round_up(batch, tb)
    grid = (batch_p // tb,)

    # Zero-pad x on both batch and feature axes.
    x_pad = jnp.zeros((batch_p, in_p), jnp.float32)
    x_pad = x_pad.at[:batch, :num_in].set(x)

    x_spec = pl.BlockSpec((tb, in_p), lambda i: (i, 0))
    out_spec = pl.BlockSpec((tb, out_p), lambda i: (i, 0))
    # Weights/biases: full-shape blocks, constant index map -> VMEM-resident.
    param_specs = [pl.BlockSpec(p.shape, lambda i: (0, 0)) for p in prepared]

    fn = pl.pallas_call(
        _mlp_kernel,
        out_shape=jax.ShapeDtypeStruct((batch_p, out_p), jnp.float32),
        grid=grid,
        in_specs=[x_spec] + param_specs,
        out_specs=out_spec,
        compiler_params=pltpu.CompilerParams(
            dimension_semantics=("parallel",),
            vmem_limit_bytes=64 << 20,
        ),
    )
    out = fn(x_pad, *prepared)
    return out[:batch, :num_out]


# ---------------------------------------------------------------------------
# Parameter init (mirrors the module's shapes; see parity note below) and a
# pure-JAX reference of the PyTorch forward (eval mode).
# ---------------------------------------------------------------------------
def _kaiming_uniform(key, out_dim, in_dim):
    # TODO(synk): PyTorch's kaiming_uniform_ default uses a=sqrt(5) semantics
    # inside nn.Linear; here plain kaiming_uniform_ (bound sqrt(6/fan_in)) is
    # used, matching the explicit init in Net1.__init__. Parity-only concern.
    bound = jnp.sqrt(6.0 / in_dim)
    return jax.random.uniform(key, (out_dim, in_dim), jnp.float32,
                              minval=-bound, maxval=bound)


def init_net1_params(key, num_in, num_h1, num_h2, num_h3, num_h4, num_h5, num_out):
    dims = [(num_h1, num_in), (num_h2, num_h1), (num_h3, num_h2),
            (num_h4, num_h3), (num_h5, num_h4), (num_out, num_h5)]
    params = []
    keys = jax.random.split(key, len(dims))
    for k, (o, i) in zip(keys, dims):
        params.append(_kaiming_uniform(k, o, i))      # W_i  (out, in)
        params.append(jnp.zeros((o,), jnp.float32))   # b_i  (out,)
    return params


def net1_reference(x, params):
    h = jnp.asarray(x, jnp.float32)
    for i in range(5):
        W, b = params[2 * i], params[2 * i + 1]
        h = jnp.maximum(h @ W.T + b, 0.0)
    W, b = params[10], params[11]
    return h @ W.T + b


if __name__ == "__main__":
    num_in, num_h1, num_h2, num_h3, num_h4, num_h5, num_out = 32, 64, 64, 32, 32, 32, 16
    drop_prob = 0.5  # unused at inference

    root = jax.random.PRNGKey(0)
    k_x, k_x2, k_p = jax.random.split(root, 3)
    params = init_net1_params(k_p, num_in, num_h1, num_h2, num_h3,
                              num_h4, num_h5, num_out)
    prepared = prepare_params(params)  # hoisted: transpose + 128-lane pad once

    # Case 1: small batch (single grid step).
    batch = 8
    x = jax.random.normal(k_x, (batch, num_in), jnp.float32)
    out = jax.block_until_ready(net1_forward(x, prepared, num_out=num_out))
    ref = net1_reference(x, params)
    assert out.shape == (batch, num_out), out.shape
    assert jnp.allclose(out, ref, atol=1e-4, rtol=1e-4), "mismatch vs reference (batch=8)"

    # Case 2: non-multiple batch with a small tile to exercise the batch grid,
    # pipelining, and batch/feature padding + slicing.
    batch2 = 200
    x2 = jax.random.normal(k_x2, (batch2, num_in), jnp.float32)
    out2 = jax.block_until_ready(
        net1_forward(x2, prepared, num_out=num_out, tile_b=64))
    ref2 = net1_reference(x2, params)
    assert out2.shape == (batch2, num_out), out2.shape
    assert jnp.allclose(out2, ref2, atol=1e-4, rtol=1e-4), "mismatch vs reference (batch=200)"

    print("KERNEL_OK")
</pallas_src>

<mosaic_0001>
module attributes {stable_mosaic.version = 11 : i64} {
  func.func @_mlp_kernel(%arg0: i32, %arg1: memref<8x128xf32, #tpu.memory_space<vmem>>, %arg2: memref<128x128xf32, #tpu.memory_space<vmem>>, %arg3: memref<1x128xf32, #tpu.memory_space<vmem>>, %arg4: memref<128x128xf32, #tpu.memory_space<vmem>>, %arg5: memref<1x128xf32, #tpu.memory_space<vmem>>, %arg6: memref<128x128xf32, #tpu.memory_space<vmem>>, %arg7: memref<1x128xf32, #tpu.memory_space<vmem>>, %arg8: memref<128x128xf32, #tpu.memory_space<vmem>>, %arg9: memref<1x128xf32, #tpu.memory_space<vmem>>, %arg10: memref<128x128xf32, #tpu.memory_space<vmem>>, %arg11: memref<1x128xf32, #tpu.memory_space<vmem>>, %arg12: memref<128x128xf32, #tpu.memory_space<vmem>>, %arg13: memref<1x128xf32, #tpu.memory_space<vmem>>, %arg14: memref<8x128xf32, #tpu.memory_space<vmem>>) attributes {dimension_semantics = [#tpu.dimension_semantics<parallel>], iteration_bounds = array<i64: 1>, scalar_prefetch = 0 : i64, scratch_operands = 0 : i64, tpu.core_type = #tpu.core_type<tc>, window_params = [{transform_indices = @transform_0, window_bounds = array<i64: 8, 128>}, {pipeline_mode = #tpu.pipeline_mode<synchronous>, transform_indices = @transform_1, window_bounds = array<i64: 128, 128>}, {pipeline_mode = #tpu.pipeline_mode<synchronous>, transform_indices = @transform_2, window_bounds = array<i64: 1, 128>}, {pipeline_mode = #tpu.pipeline_mode<synchronous>, transform_indices = @transform_3, window_bounds = array<i64: 128, 128>}, {pipeline_mode = #tpu.pipeline_mode<synchronous>, transform_indices = @transform_4, window_bounds = array<i64: 1, 128>}, {pipeline_mode = #tpu.pipeline_mode<synchronous>, transform_indices = @transform_5, window_bounds = array<i64: 128, 128>}, {pipeline_mode = #tpu.pipeline_mode<synchronous>, transform_indices = @transform_6, window_bounds = array<i64: 1, 128>}, {pipeline_mode = #tpu.pipeline_mode<synchronous>, transform_indices = @transform_7, window_bounds = array<i64: 128, 128>}, {pipeline_mode = #tpu.pipeline_mode<synchronous>, transform_indices = @transform_8, window_bounds = array<i64: 1, 128>}, {pipeline_mode = #tpu.pipeline_mode<synchronous>, transform_indices = @transform_9, window_bounds = array<i64: 128, 128>}, {pipeline_mode = #tpu.pipeline_mode<synchronous>, transform_indices = @transform_10, window_bounds = array<i64: 1, 128>}, {pipeline_mode = #tpu.pipeline_mode<synchronous>, transform_indices = @transform_11, window_bounds = array<i64: 128, 128>}, {pipeline_mode = #tpu.pipeline_mode<synchronous>, transform_indices = @transform_12, window_bounds = array<i64: 1, 128>}, {transform_indices = @transform_13, window_bounds = array<i64: 8, 128>}]} {
    %c0 = arith.constant 0 : index
    %c0_0 = arith.constant 0 : index
    %0 = vector.load %arg1[%c0, %c0_0] : memref<8x128xf32, #tpu.memory_space<vmem>>, vector<8x128xf32>
    %c0_1 = arith.constant 0 : index
    %c0_2 = arith.constant 0 : index
    %1 = vector.load %arg2[%c0_1, %c0_2] : memref<128x128xf32, #tpu.memory_space<vmem>>, vector<128x128xf32>
    %cst = arith.constant dense<0.000000e+00> : vector<8x128xf32>
    %2 = tpu.matmul %0, %1, %cst {dimension_numbers = #tpu.dot_dimension_numbers<[1], [0], [0], [1], [0, 0, 1, 1], [], []>} : vector<8x128xf32>, vector<128x128xf32>, vector<8x128xf32> -> vector<8x128xf32>
    %c0_3 = arith.constant 0 : index
    %c0_4 = arith.constant 0 : index
    %3 = vector.load %arg3[%c0_3, %c0_4] : memref<1x128xf32, #tpu.memory_space<vmem>>, vector<1x128xf32>
    %4 = vector.broadcast %3 : vector<1x128xf32> to vector<8x128xf32>
    %5 = arith.addf %2, %4 : vector<8x128xf32>
    %cst_5 = arith.constant 0.000000e+00 : f32
    %6 = vector.broadcast %cst_5 : f32 to vector<8x128xf32>
    %7 = arith.maximumf %5, %6 : vector<8x128xf32>
    %c0_6 = arith.constant 0 : index
    %c0_7 = arith.constant 0 : index
    %8 = vector.load %arg4[%c0_6, %c0_7] : memref<128x128xf32, #tpu.memory_space<vmem>>, vector<128x128xf32>
    %cst_8 = arith.constant dense<0.000000e+00> : vector<8x128xf32>
    %9 = tpu.matmul %7, %8, %cst_8 {dimension_numbers = #tpu.dot_dimension_numbers<[1], [0], [0], [1], [0, 0, 1, 1], [], []>} : vector<8x128xf32>, vector<128x128xf32>, vector<8x128xf32> -> vector<8x128xf32>
    %c0_9 = arith.constant 0 : index
    %c0_10 = arith.constant 0 : index
    %10 = vector.load %arg5[%c0_9, %c0_10] : memref<1x128xf32, #tpu.memory_space<vmem>>, vector<1x128xf32>
    %11 = vector.broadcast %10 : vector<1x128xf32> to vector<8x128xf32>
    %12 = arith.addf %9, %11 : vector<8x128xf32>
    %cst_11 = arith.constant 0.000000e+00 : f32
    %13 = vector.broadcast %cst_11 : f32 to vector<8x128xf32>
    %14 = arith.maximumf %12, %13 : vector<8x128xf32>
    %c0_12 = arith.constant 0 : index
    %c0_13 = arith.constant 0 : index
    %15 = vector.load %arg6[%c0_12, %c0_13] : memref<128x128xf32, #tpu.memory_space<vmem>>, vector<128x128xf32>
    %cst_14 = arith.constant dense<0.000000e+00> : vector<8x128xf32>
    %16 = tpu.matmul %14, %15, %cst_14 {dimension_numbers = #tpu.dot_dimension_numbers<[1], [0], [0], [1], [0, 0, 1, 1], [], []>} : vector<8x128xf32>, vector<128x128xf32>, vector<8x128xf32> -> vector<8x128xf32>
    %c0_15 = arith.constant 0 : index
    %c0_16 = arith.constant 0 : index
    %17 = vector.load %arg7[%c0_15, %c0_16] : memref<1x128xf32, #tpu.memory_space<vmem>>, vector<1x128xf32>
    %18 = vector.broadcast %17 : vector<1x128xf32> to vector<8x128xf32>
    %19 = arith.addf %16, %18 : vector<8x128xf32>
    %cst_17 = arith.constant 0.000000e+00 : f32
    %20 = vector.broadcast %cst_17 : f32 to vector<8x128xf32>
    %21 = arith.maximumf %19, %20 : vector<8x128xf32>
    %c0_18 = arith.constant 0 : index
    %c0_19 = arith.constant 0 : index
    %22 = vector.load %arg8[%c0_18, %c0_19] : memref<128x128xf32, #tpu.memory_space<vmem>>, vector<128x128xf32>
    %cst_20 = arith.constant dense<0.000000e+00> : vector<8x128xf32>
    %23 = tpu.matmul %21, %22, %cst_20 {dimension_numbers = #tpu.dot_dimension_numbers<[1], [0], [0], [1], [0, 0, 1, 1], [], []>} : vector<8x128xf32>, vector<128x128xf32>, vector<8x128xf32> -> vector<8x128xf32>
    %c0_21 = arith.constant 0 : index
    %c0_22 = arith.constant 0 : index
    %24 = vector.load %arg9[%c0_21, %c0_22] : memref<1x128xf32, #tpu.memory_space<vmem>>, vector<1x128xf32>
    %25 = vector.broadcast %24 : vector<1x128xf32> to vector<8x128xf32>
    %26 = arith.addf %23, %25 : vector<8x128xf32>
    %cst_23 = arith.constant 0.000000e+00 : f32
    %27 = vector.broadcast %cst_23 : f32 to vector<8x128xf32>
    %28 = arith.maximumf %26, %27 : vector<8x128xf32>
    %c0_24 = arith.constant 0 : index
    %c0_25 = arith.constant 0 : index
    %29 = vector.load %arg10[%c0_24, %c0_25] : memref<128x128xf32, #tpu.memory_space<vmem>>, vector<128x128xf32>
    %cst_26 = arith.constant dense<0.000000e+00> : vector<8x128xf32>
    %30 = tpu.matmul %28, %29, %cst_26 {dimension_numbers = #tpu.dot_dimension_numbers<[1], [0], [0], [1], [0, 0, 1, 1], [], []>} : vector<8x128xf32>, vector<128x128xf32>, vector<8x128xf32> -> vector<8x128xf32>
    %c0_27 = arith.constant 0 : index
    %c0_28 = arith.constant 0 : index
    %31 = vector.load %arg11[%c0_27, %c0_28] : memref<1x128xf32, #tpu.memory_space<vmem>>, vector<1x128xf32>
    %32 = vector.broadcast %31 : vector<1x128xf32> to vector<8x128xf32>
    %33 = arith.addf %30, %32 : vector<8x128xf32>
    %cst_29 = arith.constant 0.000000e+00 : f32
    %34 = vector.broadcast %cst_29 : f32 to vector<8x128xf32>
    %35 = arith.maximumf %33, %34 : vector<8x128xf32>
    %c0_30 = arith.constant 0 : index
    %c0_31 = arith.constant 0 : index
    %36 = vector.load %arg12[%c0_30, %c0_31] : memref<128x128xf32, #tpu.memory_space<vmem>>, vector<128x128xf32>
    %cst_32 = arith.constant dense<0.000000e+00> : vector<8x128xf32>
    %37 = tpu.matmul %35, %36, %cst_32 {dimension_numbers = #tpu.dot_dimension_numbers<[1], [0], [0], [1], [0, 0, 1, 1], [], []>} : vector<8x128xf32>, vector<128x128xf32>, vector<8x128xf32> -> vector<8x128xf32>
    %c0_33 = arith.constant 0 : index
    %c0_34 = arith.constant 0 : index
    %38 = vector.load %arg13[%c0_33, %c0_34] : memref<1x128xf32, #tpu.memory_space<vmem>>, vector<1x128xf32>
    %39 = vector.broadcast %38 : vector<1x128xf32> to vector<8x128xf32>
    %40 = arith.addf %37, %39 : vector<8x128xf32>
    %c0_35 = arith.constant 0 : index
    %c0_36 = arith.constant 0 : index
    %41 = vector.load %arg14[%c0_35, %c0_36] : memref<8x128xf32, #tpu.memory_space<vmem>>, vector<8x128xf32>
    tpu.vector_store %arg14[%c0_35, %c0_36], %40 {strides = array<i32>} : memref<8x128xf32, #tpu.memory_space<vmem>>, vector<8x128xf32>,
    return
  }
  func.func @transform_0(%arg0: i32) -> (i32, i32) {
    %c0_i32 = arith.constant 0 : i32
    %c0_i32_0 = arith.constant 0 : i32
    return %arg0, %c0_i32 : i32, i32
  }
  func.func @transform_1(%arg0: i32) -> (i32, i32) {
    %c0_i32 = arith.constant 0 : i32
    %c0_i32_0 = arith.constant 0 : i32
    %c0_i32_1 = arith.constant 0 : i32
    return %c0_i32, %c0_i32_0 : i32, i32
  }
  func.func @transform_2(%arg0: i32) -> (i32, i32) {
    %c0_i32 = arith.constant 0 : i32
    %c0_i32_0 = arith.constant 0 : i32
    %c0_i32_1 = arith.constant 0 : i32
    return %c0_i32, %c0_i32_0 : i32, i32
  }
  func.func @transform_3(%arg0: i32) -> (i32, i32) {
    %c0_i32 = arith.constant 0 : i32
    %c0_i32_0 = arith.constant 0 : i32
    %c0_i32_1 = arith.constant 0 : i32
    return %c0_i32, %c0_i32_0 : i32, i32
  }
  func.func @transform_4(%arg0: i32) -> (i32, i32) {
    %c0_i32 = arith.constant 0 : i32
    %c0_i32_0 = arith.constant 0 : i32
    %c0_i32_1 = arith.constant 0 : i32
    return %c0_i32, %c0_i32_0 : i32, i32
  }
  func.func @transform_5(%arg0: i32) -> (i32, i32) {
    %c0_i32 = arith.constant 0 : i32
    %c0_i32_0 = arith.constant 0 : i32
    %c0_i32_1 = arith.constant 0 : i32
    return %c0_i32, %c0_i32_0 : i32, i32
  }
  func.func @transform_6(%arg0: i32) -> (i32, i32) {
    %c0_i32 = arith.constant 0 : i32
    %c0_i32_0 = arith.constant 0 : i32
    %c0_i32_1 = arith.constant 0 : i32
    return %c0_i32, %c0_i32_0 : i32, i32
  }
  func.func @transform_7(%arg0: i32) -> (i32, i32) {
    %c0_i32 = arith.constant 0 : i32
    %c0_i32_0 = arith.constant 0 : i32
    %c0_i32_1 = arith.constant 0 : i32
    return %c0_i32, %c0_i32_0 : i32, i32
  }
  func.func @transform_8(%arg0: i32) -> (i32, i32) {
    %c0_i32 = arith.constant 0 : i32
    %c0_i32_0 = arith.constant 0 : i32
    %c0_i32_1 = arith.constant 0 : i32
    return %c0_i32, %c0_i32_0 : i32, i32
  }
  func.func @transform_9(%arg0: i32) -> (i32, i32) {
    %c0_i32 = arith.constant 0 : i32
    %c0_i32_0 = arith.constant 0 : i32
    %c0_i32_1 = arith.constant 0 : i32
    return %c0_i32, %c0_i32_0 : i32, i32
  }
  func.func @transform_10(%arg0: i32) -> (i32, i32) {
    %c0_i32 = arith.constant 0 : i32
    %c0_i32_0 = arith.constant 0 : i32
    %c0_i32_1 = arith.constant 0 : i32
    return %c0_i32, %c0_i32_0 : i32, i32
  }
  func.func @transform_11(%arg0: i32) -> (i32, i32) {
    %c0_i32 = arith.constant 0 : i32
    %c0_i32_0 = arith.constant 0 : i32
    %c0_i32_1 = arith.constant 0 : i32
    return %c0_i32, %c0_i32_0 : i32, i32
  }
  func.func @transform_12(%arg0: i32) -> (i32, i32) {
    %c0_i32 = arith.constant 0 : i32
    %c0_i32_0 = arith.constant 0 : i32
    %c0_i32_1 = arith.constant 0 : i32
    return %c0_i32, %c0_i32_0 : i32, i32
  }
  func.func @transform_13(%arg0: i32) -> (i32, i32) {
    %c0_i32 = arith.constant 0 : i32
    %c0_i32_0 = arith.constant 0 : i32
    return %arg0, %c0_i32 : i32, i32
  }
}

</mosaic_0001>

<bundles_post_ra>
// kernel: net1_forward.1
= control target key start
LH: loop header
LB: loop body
LE: loop exit
PB: predicated region body
PF: predicated region fallthrough
CT: control target
= control target key end

     0   :  { %18 = vsyncpa [#allocation3], 0  ;;  %s1933_s0 = inlined_call_operand.hbm [shape: f32[8,128], index: 0, kind: input, shape index: {}]   ;;  %s1934_s1 = inlined_call_operand.hbm [shape: f32[128,128], index: 1, kind: input, shape index: {}]   ;;  %s1935_s2 = inlined_call_operand.hbm [shape: f32[1,128], index: 2, kind: input, shape index: {}]   ;;  %s1936_s3 = inlined_call_operand.hbm [shape: f32[128,128], index: 3, kind: input, shape index: {}]   ;;  %s1937_s4 = inlined_call_operand.hbm [shape: f32[1,128], index: 4, kind: input, shape index: {}]   ;;  %s1938_s5 = inlined_call_operand.hbm [shape: f32[128,128], index: 5, kind: input, shape index: {}]   ;;  %s1939_s6 = inlined_call_operand.hbm [shape: f32[1,128], index: 6, kind: input, shape index: {}]   ;;  %s1940_s7 = inlined_call_operand.hbm [shape: f32[128,128], index: 7, kind: input, shape index: {}]   ;;  %s1941_s8 = inlined_call_operand.hbm [shape: f32[1,128], index: 8, kind: input, shape index: {}]   ;;  %s1942_s9 = inlined_call_operand.hbm [shape: f32[128,128], index: 9, kind: input, shape index: {}]   ;;  %s1943_s10 = inlined_call_operand.hbm [shape: f32[1,128], index: 10, kind: input, shape index: {}]   ;;  %s1944_s11 = inlined_call_operand.hbm [shape: f32[128,128], index: 11, kind: input, shape index: {}]   ;;  %s1945_s12 = inlined_call_operand.hbm [shape: f32[1,128], index: 12, kind: input, shape index: {}]   ;;  %s1946_s13 = inlined_call_operand.hbm [shape: f32[8,128], index: 13, kind: output, shape index: {}]  }
   0x1   :  { %19 = vsyncpa [#allocation6], 0 }
   0x2   :  { %20 = vsyncpa [#allocation9], 0 }
   0x3   :  { %21 = vsyncpa [#allocation12], 0 }
   0x4   :  { %22 = vsyncpa [#allocation15], 0 }
   0x5   :  { %23 = vsyncpa [#allocation18], 0 }
   0x6   :  { %24 = vsyncpa [#allocation21], 0 }
   0x7   :  { %25 = vsyncpa [#allocation4], 0  ;;  %s1598_s25 = smov [#allocation5]   ;;  %s1274_s29 = scalar_lea.hbm %s1934_s1, 2048 }
   0x8   :  { %s41_s26 = sshll.u32 %s1598_s25, 4  ;;  %p1275_p0 = scmp.ne.s32.totalorder %s1934_s1, %s1274_s29  ;;  %s42_s26 = int_to_ptr.vmem [resolvable:$true] %s41_s26 }
   0x9   :  { %p1278_p1 = scmp.lt.u32.totalorder %s1274_s29, %s1934_s1 }
   0xb   :  { %p1280_p2 = pnand %p1278_p1, %p1275_p0 }
   0xd   :  { %1283 = shalt.err (!%p1280_p2)
}
   0xe   :  { %s1284_s17 = scalar_lea.vmem %s42_s26, 2048  ;;  %p1289_p4 = scmp.lt.s32.totalorder %s42_s26, %s42_s26 }
   0xf   :  { %p1285_p3 = scmp.ne.s32.totalorder %s42_s26, %s1284_s17  ;;  %p1290_p5 = scmp.lt.s32.totalorder %s1284_s17, %s1284_s17 }
  0x11   :  { %p1291_p6 = por %p1290_p5, %p1289_p4 }
  0x13   :  { %p1292_p7 = pnand %p1291_p6, %p1285_p3 }
  0x15   :  { %1295 = shalt.err (!%p1292_p7)
}
  0x16   :  { %s1599_s18 = smov 128   ;;  %s1600_s19 = smov 8  }
  0x17   :  { %47 = dma.hbm_to_vmem [thread:$0]  %s1934_s1, 2048, %s42_s26, [#allocation6], %s1599_s18, %s1599_s18, %s1600_s19  }
  0x18   :  { %s1601_s22 = smov [#allocation8]   ;;  %s1602_s24 = smov [#allocation11]  }
  0x19   :  { %s63_s23 = sshll.u32 %s1601_s22, 4  ;;  %s85_s25 = sshll.u32 %s1602_s24, 4  ;;  %s64_s23 = int_to_ptr.vmem [resolvable:$true] %s63_s23  ;;  %s86_s25 = int_to_ptr.vmem [resolvable:$true] %s85_s25 }
  0x1a   :  { %s1296_s29 = scalar_lea.hbm %s1936_s3, 2048 }
  0x1b   :  { %p1297_p8 = scmp.ne.s32.totalorder %s1936_s3, %s1296_s29  ;;  %p1300_p9 = scmp.lt.u32.totalorder %s1296_s29, %s1936_s3 }
  0x1d   :  { %p1302_p10 = pnand %p1300_p9, %p1297_p8 }
  0x1f   :  { %1305 = shalt.err (!%p1302_p10)
}
  0x20   :  { %s1306_s1 = scalar_lea.vmem %s64_s23, 2048  ;;  %p1311_p12 = scmp.lt.s32.totalorder %s64_s23, %s64_s23 }
  0x21   :  { %p1307_p11 = scmp.ne.s32.totalorder %s64_s23, %s1306_s1  ;;  %p1312_p13 = scmp.lt.s32.totalorder %s1306_s1, %s1306_s1 }
  0x23   :  { %p1313_p0 = por %p1312_p13, %p1311_p12 }
  0x25   :  { %p1314_p1 = pnand %p1313_p0, %p1307_p11 }
  0x27   :  { %1317 = shalt.err (!%p1314_p1)
}
  0x28   :  { %69 = dma.hbm_to_vmem [thread:$0]  %s1936_s3, 2048, %s64_s23, [#allocation9], %s1599_s18, %s1599_s18, %s1600_s19  }
  0x29   :  { %s1318_s22 = scalar_lea.hbm %s1938_s5, 2048 }
  0x2a   :  { %p1319_p2 = scmp.ne.s32.totalorder %s1938_s5, %s1318_s22  ;;  %p1322_p3 = scmp.lt.u32.totalorder %s1318_s22, %s1938_s5 }
  0x2c   :  { %p1324_p4 = pnand %p1322_p3, %p1319_p2 }
  0x2e   :  { %1327 = shalt.err (!%p1324_p4)
}
  0x2f   :  { %s1328_s30 = scalar_lea.vmem %s86_s25, 2048  ;;  %p1333_p6 = scmp.lt.s32.totalorder %s86_s25, %s86_s25 }
  0x30   :  { %p1329_p5 = scmp.ne.s32.totalorder %s86_s25, %s1328_s30  ;;  %p1334_p7 = scmp.lt.s32.totalorder %s1328_s30, %s1328_s30 }
  0x32   :  { %p1335_p8 = por %p1334_p7, %p1333_p6 }
  0x34   :  { %p1336_p9 = pnand %p1335_p8, %p1329_p5 }
  0x36   :  { %1339 = shalt.err (!%p1336_p9)
}
  0x37   :  { %91 = dma.hbm_to_vmem [thread:$0]  %s1938_s5, 2048, %s86_s25, [#allocation12], %s1599_s18, %s1599_s18, %s1600_s19  }
  0x38   :  { %s1603_s14 = smov [#allocation14]   ;;  %s1604_s16 = smov [#allocation17]  }
  0x39   :  { %s107_s15 = sshll.u32 %s1603_s14, 4  ;;  %s129_s1 = sshll.u32 %s1604_s16, 4  ;;  %s108_s15 = int_to_ptr.vmem [resolvable:$true] %s107_s15  ;;  %s130_s1 = int_to_ptr.vmem [resolvable:$true] %s129_s1 }
  0x3a   :  { %s1340_s20 = scalar_lea.hbm %s1940_s7, 2048 }
  0x3b   :  { %p1341_p10 = scmp.ne.s32.totalorder %s1940_s7, %s1340_s20  ;;  %p1344_p11 = scmp.lt.u32.totalorder %s1340_s20, %s1940_s7 }
  0x3d   :  { %p1346_p12 = pnand %p1344_p11, %p1341_p10 }
  0x3f   :  { %1349 = shalt.err (!%p1346_p12)
}
  0x40   :  { %s1350_s5 = scalar_lea.vmem %s108_s15, 2048  ;;  %p1355_p0 = scmp.lt.s32.totalorder %s108_s15, %s108_s15 }
  0x41   :  { %p1351_p13 = scmp.ne.s32.totalorder %s108_s15, %s1350_s5  ;;  %p1356_p1 = scmp.lt.s32.totalorder %s1350_s5, %s1350_s5 }
  0x43   :  { %p1357_p2 = por %p1356_p1, %p1355_p0 }
  0x45   :  { %p1358_p3 = pnand %p1357_p2, %p1351_p13 }
  0x47   :  { %1361 = shalt.err (!%p1358_p3)
}
  0x48   :  { %113 = dma.hbm_to_vmem [thread:$0]  %s1940_s7, 2048, %s108_s15, [#allocation15], %s1599_s18, %s1599_s18, %s1600_s19  }
  0x49   :  { %s1362_s3 = scalar_lea.hbm %s1942_s9, 2048 }
  0x4a   :  { %p1363_p4 = scmp.ne.s32.totalorder %s1942_s9, %s1362_s3  ;;  %p1366_p5 = scmp.lt.u32.totalorder %s1362_s3, %s1942_s9 }
  0x4c   :  { %p1368_p6 = pnand %p1366_p5, %p1363_p4 }
  0x4e   :  { %1371 = shalt.err (!%p1368_p6)
}
  0x4f   :  { %s1372_s17 = scalar_lea.vmem %s130_s1, 2048  ;;  %p1377_p8 = scmp.lt.s32.totalorder %s130_s1, %s130_s1 }
  0x50   :  { %p1373_p7 = scmp.ne.s32.totalorder %s130_s1, %s1372_s17  ;;  %p1378_p9 = scmp.lt.s32.totalorder %s1372_s17, %s1372_s17 }
  0x52   :  { %p1379_p10 = por %p1378_p9, %p1377_p8 }
  0x54   :  { %p1380_p11 = pnand %p1379_p10, %p1373_p7 }
  0x56   :  { %1383 = shalt.err (!%p1380_p11)
}
  0x57   :  { %135 = dma.hbm_to_vmem [thread:$0]  %s1942_s9, 2048, %s130_s1, [#allocation18], %s1599_s18, %s1599_s18, %s1600_s19  }
  0x58   :  { %s1605_s20 = smov [#allocation20]   ;;  %s1606_s22 = smov [#allocation2]  }
  0x59   :  { %s151_s21 = sshll.u32 %s1605_s20, 4  ;;  %s32_s24 = sshll.u32 %s1606_s22, 4  ;;  %s152_s21 = int_to_ptr.vmem [resolvable:$true] %s151_s21  ;;  %s33_s24 = int_to_ptr.vmem [resolvable:$true] %s32_s24 }
  0x5a   :  { %s1384_s25 = scalar_lea.hbm %s1944_s11, 2048 }
  0x5b   :  { %p1385_p12 = scmp.ne.s32.totalorder %s1944_s11, %s1384_s25  ;;  %p1388_p13 = scmp.lt.u32.totalorder %s1384_s25, %s1944_s11 }
  0x5d   :  { %p1390_p0 = pnand %p1388_p13, %p1385_p12 }
  0x5f   :  { %1393 = shalt.err (!%p1390_p0)
}
  0x60   :  { %s1394_s9 = scalar_lea.vmem %s152_s21, 2048  ;;  %p1399_p2 = scmp.lt.s32.totalorder %s152_s21, %s152_s21 }
  0x61   :  { %p1395_p1 = scmp.ne.s32.totalorder %s152_s21, %s1394_s9  ;;  %p1400_p3 = scmp.lt.s32.totalorder %s1394_s9, %s1394_s9 }
  0x63   :  { %p1401_p4 = por %p1400_p3, %p1399_p2 }
  0x65   :  { %p1402_p5 = pnand %p1401_p4, %p1395_p1 }
  0x67   :  { %1405 = shalt.err (!%p1402_p5)
}
  0x68   :  { %157 = dma.hbm_to_vmem [thread:$0]  %s1944_s11, 2048, %s152_s21, [#allocation21], %s1599_s18, %s1599_s18, %s1600_s19  }
  0x69   :  { %s1406_s26 = scalar_lea.hbm %s1933_s0, 128 }
  0x6a   :  { %p1407_p6 = scmp.ne.s32.totalorder %s1933_s0, %s1406_s26  ;;  %p1410_p7 = scmp.lt.u32.totalorder %s1406_s26, %s1933_s0 }
  0x6c   :  { %p1412_p8 = pnand %p1410_p7, %p1407_p6 }
  0x6e   :  { %1415 = shalt.err (!%p1412_p8)
}
  0x6f   :  { %s1416_s22 = scalar_lea.vmem %s33_s24, 128  ;;  %p1421_p10 = scmp.lt.s32.totalorder %s33_s24, %s33_s24 }
  0x70   :  { %p1417_p9 = scmp.ne.s32.totalorder %s33_s24, %s1416_s22  ;;  %p1422_p11 = scmp.lt.s32.totalorder %s1416_s22, %s1416_s22 }
  0x72   :  { %p1423_p12 = por %p1422_p11, %p1421_p10 }
  0x74   :  { %p1424_p13 = pnand %p1423_p12, %p1417_p9 }
  0x76   :  { %1427 = shalt.err (!%p1424_p13)
}
  0x77   :  { %35 = dma.hbm_to_vmem [thread:$0]  %s1933_s0, 128, %s33_s24, [#allocation3]  }
  0x78   :  { %s1607_s19 = smov [#allocation7]   ;;  %s1608_s27 = smov [#allocation10]  }
  0x79   :  { %s54_s21 = sshll.u32 %s1607_s19, 4  ;;  %s76_s5 = sshll.u32 %s1608_s27, 4  ;;  %s55_s21 = int_to_ptr.vmem [resolvable:$true] %s54_s21  ;;  %s77_s5 = int_to_ptr.vmem [resolvable:$true] %s76_s5 }
  0x7a   :  { %s1428_s29 = scalar_lea.hbm %s1935_s2, 16 }
  0x7b   :  { %p1429_p0 = scmp.ne.s32.totalorder %s1935_s2, %s1428_s29  ;;  %p1432_p1 = scmp.lt.u32.totalorder %s1428_s29, %s1935_s2 }
  0x7d   :  { %p1434_p2 = pnand %p1432_p1, %p1429_p0 }
  0x7f   :  { %1437 = shalt.err (!%p1434_p2)
}
  0x80   :  { %s1438_s0 = scalar_lea.vmem %s55_s21, 16  ;;  %s1442_s24 = scalar_lea.vmem %s55_s21, 32 }
  0x81   :  { %p1439_p3 = scmp.ne.s32.totalorder %s55_s21, %s1438_s0  ;;  %p1443_p4 = scmp.lt.s32.totalorder %s55_s21, %s55_s21 }
  0x82   :  { %p1444_p5 = scmp.lt.s32.totalorder %s1442_s24, %s1438_s0 }
  0x84   :  { %p1445_p6 = por %p1444_p5, %p1443_p4 }
  0x86   :  { %p1446_p7 = pnand %p1445_p6, %p1439_p3 }
  0x88   :  { %1449 = shalt.err (!%p1446_p7)
}
  0x89   :  { %57 = dma.hbm_to_vmem [thread:$0]  %s1935_s2, 16, %s55_s21, [#allocation6]  }
  0x8a   :  { %s1450_s17 = scalar_lea.hbm %s1937_s4, 16 }
  0x8b   :  { %p1451_p8 = scmp.ne.s32.totalorder %s1937_s4, %s1450_s17  ;;  %p1454_p9 = scmp.lt.u32.totalorder %s1450_s17, %s1937_s4 }
  0x8d   :  { %p1456_p10 = pnand %p1454_p9, %p1451_p8 }
  0x8f   :  { %1459 = shalt.err (!%p1456_p10)
}
  0x90   :  { %s1460_s11 = scalar_lea.vmem %s77_s5, 16  ;;  %s1464_s18 = scalar_lea.vmem %s77_s5, 32 }
  0x91   :  { %p1461_p11 = scmp.ne.s32.totalorder %s77_s5, %s1460_s11  ;;  %p1465_p12 = scmp.lt.s32.totalorder %s77_s5, %s77_s5 }
  0x92   :  { %p1466_p13 = scmp.lt.s32.totalorder %s1464_s18, %s1460_s11 }
  0x94   :  { %p1467_p0 = por %p1466_p13, %p1465_p12 }
  0x96   :  { %p1468_p1 = pnand %p1467_p0, %p1461_p11 }
  0x98   :  { %1471 = shalt.err (!%p1468_p1)
}
  0x99   :  { %79 = dma.hbm_to_vmem [thread:$0]  %s1937_s4, 16, %s77_s5, [#allocation9]  }
  0x9a   :  { %s1609_s21 = smov [#allocation13]   ;;  %s1610_s25 = smov [#allocation16]  }
  0x9b   :  { %s98_s27 = sshll.u32 %s1609_s21, 4  ;;  %s120_s28 = sshll.u32 %s1610_s25, 4  ;;  %s99_s27 = int_to_ptr.vmem [resolvable:$true] %s98_s27  ;;  %s121_s28 = int_to_ptr.vmem [resolvable:$true] %s120_s28 }
  0x9c   :  { %s1472_s3 = scalar_lea.hbm %s1939_s6, 16 }
  0x9d   :  { %p1473_p2 = scmp.ne.s32.totalorder %s1939_s6, %s1472_s3  ;;  %p1476_p3 = scmp.lt.u32.totalorder %s1472_s3, %s1939_s6 }
  0x9f   :  { %p1478_p4 = pnand %p1476_p3, %p1473_p2 }
  0xa1   :  { %1481 = shalt.err (!%p1478_p4)
}
  0xa2   :  { %s1482_s4 = scalar_lea.vmem %s99_s27, 16  ;;  %s1486_s5 = scalar_lea.vmem %s99_s27, 32 }
  0xa3   :  { %p1483_p5 = scmp.ne.s32.totalorder %s99_s27, %s1482_s4  ;;  %p1487_p6 = scmp.lt.s32.totalorder %s99_s27, %s99_s27 }
  0xa4   :  { %p1488_p7 = scmp.lt.s32.totalorder %s1486_s5, %s1482_s4 }
  0xa6   :  { %p1489_p8 = por %p1488_p7, %p1487_p6 }
  0xa8   :  { %p1490_p9 = pnand %p1489_p8, %p1483_p5 }
  0xaa   :  { %1493 = shalt.err (!%p1490_p9)
}
  0xab   :  { %101 = dma.hbm_to_vmem [thread:$0]  %s1939_s6, 16, %s99_s27, [#allocation12]  }
  0xac   :  { %s1494_s17 = scalar_lea.hbm %s1941_s8, 16 }
  0xad   :  { %p1495_p10 = scmp.ne.s32.totalorder %s1941_s8, %s1494_s17  ;;  %p1498_p11 = scmp.lt.u32.totalorder %s1494_s17, %s1941_s8 }
  0xaf   :  { %p1500_p12 = pnand %p1498_p11, %p1495_p10 }
  0xb1   :  { %1503 = shalt.err (!%p1500_p12)
}
  0xb2   :  { %s1504_s11 = scalar_lea.vmem %s121_s28, 16  ;;  %s1508_s18 = scalar_lea.vmem %s121_s28, 32 }
  0xb3   :  { %p1505_p13 = scmp.ne.s32.totalorder %s121_s28, %s1504_s11  ;;  %p1509_p0 = scmp.lt.s32.totalorder %s121_s28, %s121_s28 }
  0xb4   :  { %p1510_p1 = scmp.lt.s32.totalorder %s1508_s18, %s1504_s11 }
  0xb6   :  { %p1511_p2 = por %p1510_p1, %p1509_p0 }
  0xb8   :  { %p1512_p3 = pnand %p1511_p2, %p1505_p13 }
  0xba   :  { %1515 = shalt.err (!%p1512_p3)
}
  0xbb   :  { %123 = dma.hbm_to_vmem [thread:$0]  %s1941_s8, 16, %s121_s28, [#allocation15]  }
  0xbc   :  { %s1611_s19 = smov [#allocation19]   ;;  %s1612_s27 = smov [#allocation22]  }
  0xbd   :  { %s142_s21 = sshll.u32 %s1611_s19, 4  ;;  %s164_s25 = sshll.u32 %s1612_s27, 4  ;;  %s143_s21 = int_to_ptr.vmem [resolvable:$true] %s142_s21  ;;  %s165_s25 = int_to_ptr.vmem [resolvable:$true] %s164_s25 }
  0xbe   :  { %s1516_s3 = scalar_lea.hbm %s1943_s10, 16 }
  0xbf   :  { %p1517_p4 = scmp.ne.s32.totalorder %s1943_s10, %s1516_s3  ;;  %p1520_p5 = scmp.lt.u32.totalorder %s1516_s3, %s1943_s10 }
  0xc1   :  { %p1522_p6 = pnand %p1520_p5, %p1517_p4 }
  0xc3   :  { %1525 = shalt.err (!%p1522_p6)
}
  0xc4   :  { %s1526_s8 = scalar_lea.vmem %s143_s21, 16  ;;  %s1530_s28 = scalar_lea.vmem %s143_s21, 32 }
  0xc5   :  { %p1527_p7 = scmp.ne.s32.totalorder %s143_s21, %s1526_s8  ;;  %p1531_p8 = scmp.lt.s32.totalorder %s143_s21, %s143_s21 }
  0xc6   :  { %p1532_p9 = scmp.lt.s32.totalorder %s1530_s28, %s1526_s8 }
  0xc8   :  { %p1533_p10 = por %p1532_p9, %p1531_p8 }
  0xca   :  { %p1534_p11 = pnand %p1533_p10, %p1527_p7 }
  0xcc   :  { %1537 = shalt.err (!%p1534_p11)
}
  0xcd   :  { %145 = dma.hbm_to_vmem [thread:$0]  %s1943_s10, 16, %s143_s21, [#allocation18]  }
  0xce   :  { %s1538_s16 = scalar_lea.hbm %s1945_s12, 16 }
  0xcf   :  { %p1539_p12 = scmp.ne.s32.totalorder %s1945_s12, %s1538_s16  ;;  %p1542_p13 = scmp.lt.u32.totalorder %s1538_s16, %s1945_s12 }
  0xd1   :  { %p1544_p0 = pnand %p1542_p13, %p1539_p12 }
  0xd3   :  { %1547 = shalt.err (!%p1544_p0)
}
  0xd4   :  { %s1548_s20 = scalar_lea.vmem %s165_s25, 16  ;;  %s1552_s22 = scalar_lea.vmem %s165_s25, 32 }
  0xd5   :  { %p1549_p1 = scmp.ne.s32.totalorder %s165_s25, %s1548_s20  ;;  %p1553_p2 = scmp.lt.s32.totalorder %s165_s25, %s165_s25 }
  0xd6   :  { %p1554_p3 = scmp.lt.s32.totalorder %s1552_s22, %s1548_s20 }
  0xd8   :  { %p1555_p4 = por %p1554_p3, %p1553_p2 }
  0xda   :  { %p1556_p5 = pnand %p1555_p4, %p1549_p1 }
  0xdc   :  { %1559 = shalt.err (!%p1556_p5)
}
  0xdd   :  { %167 = dma.hbm_to_vmem [thread:$0]  %s1945_s12, 16, %s165_s25, [#allocation21]  }
  0xde   :  { %1582 = dma.done.wait [#allocation3], 128  }
  0xdf   :  { %1583 = vsyncadd [#allocation3], 4294967168 }
  0xe0   :  { %1584 = dma.done.wait [#allocation6], 2064  }
  0xe1   :  { %1585 = vsyncadd [#allocation6], 4294965232 }
  0xe2   :  { %1586 = dma.done.wait [#allocation9], 2064  }
  0xe3   :  { %1587 = vsyncadd [#allocation9], 4294965232 }
  0xe4   :  { %1588 = dma.done.wait [#allocation12], 2064  }
  0xe5   :  { %1589 = vsyncadd [#allocation12], 4294965232 }
  0xe6   :  { %1590 = dma.done.wait [#allocation15], 2064  }
  0xe7   :  { %1591 = vsyncadd [#allocation15], 4294965232 }
  0xe8   :  { %1592 = dma.done.wait [#allocation18], 2064  }
  0xe9   :  { %1593 = vsyncadd [#allocation18], 4294965232 }
  0xea   :  { %1594 = dma.done.wait [#allocation21], 2064  }
  0xeb   :  { %1595 = vsyncadd [#allocation21], 4294965232  ;;  %v1613_v0 = vmov 0.0|0.0   ;;  %vm1614_vm0 = vmmov 0   ;;  %v1615_v1 = vmov 0.0   ;;  %v208_v2 = vld [vmem:[#allocation5] sm:$0xff] }
  0xec   :  { %1111 = vmatprep.subr.bf16.mxu0 %v1613_v0  ;;  %933 = vmatprep.mubr.msk.f32.mxu0 %vm1614_vm0, %v1615_v1  ;;  %v209_v3 = vld [vmem:[#allocation5 + $0x8] sm:$0xff]  ;;  %v210_v4 = vld [vmem:[#allocation5 + $0x10] sm:$0xff]  ;;  %v211_v6 = vld [vmem:[#allocation5 + $0x18] sm:$0xff]  ;;  %s1616_s12 = smov [#allocation23]  }
  0xed   :  { %1135 = vmatprep.subr.bf16.mxu1 %v1613_v0  ;;  %968 = vmatprep.mubr.msk.f32.mxu1 %vm1614_vm0, %v1615_v1  ;;  %v1112_v5 = vpack.c.bf16 %v209_v3, %v208_v2  ;;  %v1115_v7 = vpack.c.bf16 %v211_v6, %v210_v4  ;;  %v212_v8 = vld [vmem:[#allocation5 + $0x20] sm:$0xff]  ;;  %v213_v9 = vld [vmem:[#allocation5 + $0x28] sm:$0xff]  ;;  %v304_v12 = vld [vmem:[#allocation8 + $0x10] sm:$0xff]  ;;  %s778_s18 = sshll.u32 %s1616_s12, 4  ;;  %s779_s18 = int_to_ptr.vmem [resolvable:$true] %s778_s18 }
  0xee   :  { %v302_v10 = vld [vmem:[#allocation8] sm:$0xff]  ;;  %v303_v11 = vld [vmem:[#allocation8 + $0x8] sm:$0xff]  ;;  %v305_v13 = vld [vmem:[#allocation8 + $0x18] sm:$0xff]  ;;  %v1118_v14 = vpack.c.bf16 %v213_v9, %v212_v8  ;;  %s1560_s6 = scalar_lea.vmem %s779_s18, 128  ;;  %p1565_p7 = scmp.lt.s32.totalorder %s779_s18, %s779_s18 }
  0xef   :  { %1113 = vmatpush3.bf16.msra.mxu0 %v1112_v5  ;;  %v1136_v15 = vpack.c.bf16 %v303_v11, %v302_v10  ;;  %v214_v16 = vld [vmem:[#allocation5 + $0x30] sm:$0xff]  ;;  %v215_v17 = vld [vmem:[#allocation5 + $0x38] sm:$0xff]  ;;  %v1139_v18 = vpack.c.bf16 %v305_v13, %v304_v12  ;;  %v306_v19 = vld [vmem:[#allocation8 + $0x20] sm:$0xff]  ;;  %p1561_p6 = scmp.ne.s32.totalorder %s779_s18, %s1560_s6  ;;  %p1566_p8 = scmp.lt.s32.totalorder %s1560_s6, %s1560_s6 }
  0xf0   :  { %1114 = vmatprep.subr.bf16.mxu0 %v1613_v0  ;;  %v307_v20 = vld [vmem:[#allocation8 + $0x28] sm:$0xff]  ;;  %v1121_v21 = vpack.c.bf16 %v215_v17, %v214_v16  ;;  %v216_v22 = vld [vmem:[#allocation5 + $0x40] sm:$0xff]  ;;  %v308_v25 = vld [vmem:[#allocation8 + $0x30] sm:$0xff] }
  0xf1   :  { %1137 = vmatpush3.bf16.msra.mxu1 %v1136_v15  ;;  %v217_v23 = vld [vmem:[#allocation5 + $0x48] sm:$0xff]  ;;  %v1142_v24 = vpack.c.bf16 %v307_v20, %v306_v19  ;;  %v309_v26 = vld [vmem:[#allocation8 + $0x38] sm:$0xff]  ;;  %v218_v28 = vld [vmem:[#allocation5 + $0x50] sm:$0xff]  ;;  %p1567_p9 = por %p1566_p8, %p1565_p7 }
  0xf2   :  { %1138 = vmatprep.subr.bf16.mxu1 %v1613_v0  ;;  %v1124_v27 = vpack.c.bf16 %v217_v23, %v216_v22  ;;  %v219_v29 = vld [vmem:[#allocation5 + $0x58] sm:$0xff]  ;;  %v1145_v30 = vpack.c.bf16 %v309_v26, %v308_v25  ;;  %v310_v31 = vld [vmem:[#allocation8 + $0x40] sm:$0xff]  ;;  %v311_v32 = vld [vmem:[#allocation8 + $0x48] sm:$0xff] }
  0xf3   :  { %1116 = vmatpush3.bf16.msra.mxu0 %v1115_v7  ;;  %v1127_v33 = vpack.c.bf16 %v219_v29, %v218_v28  ;;  %v220_v34 = vld [vmem:[#allocation5 + $0x60] sm:$0xff]  ;;  %v221_v35 = vld [vmem:[#allocation5 + $0x68] sm:$0xff]  ;;  %v1148_v36 = vpack.c.bf16 %v311_v32, %v310_v31  ;;  %v312_v37 = vld [vmem:[#allocation8 + $0x50] sm:$0xff]  ;;  %p1568_p10 = pnand %p1567_p9, %p1561_p6 }
  0xf4   :  { %1117 = vmatprep.subr.bf16.mxu0 %v1613_v0  ;;  %v313_v38 = vld [vmem:[#allocation8 + $0x58] sm:$0xff]  ;;  %v1130_v39 = vpack.c.bf16 %v221_v35, %v220_v34  ;;  %v222_v40 = vld [vmem:[#allocation5 + $0x70] sm:$0xff]  ;;  %v314_v43 = vld [vmem:[#allocation8 + $0x60] sm:$0xff] }
  0xf5   :  { %1140 = vmatpush3.bf16.msra.mxu1 %v1139_v18  ;;  %v223_v41 = vld [vmem:[#allocation5 + $0x78] sm:$0xff]  ;;  %v1151_v42 = vpack.c.bf16 %v313_v38, %v312_v37  ;;  %v315_v44 = vld [vmem:[#allocation8 + $0x68] sm:$0xff]  ;;  %v793_v10 = vld [vmem:[#allocation7] ss:$0 sm:$0xff] }
  0xf6   :  { %1141 = vmatprep.subr.bf16.mxu1 %v1613_v0  ;;  %v1133_v45 = vpack.c.bf16 %v223_v41, %v222_v40  ;;  %v1154_v46 = vpack.c.bf16 %v315_v44, %v314_v43  ;;  %v207_v47 = vld [vmem:[#allocation2] sm:$0xff]  ;;  %v396_v51 = vld [vmem:[#allocation11] sm:$0xff]  ;;  %v397_v52 = vld [vmem:[#allocation11 + $0x8] sm:$0xff] }
  0xf7   :  { %1119 = vmatpush3.bf16.msra.mxu0 %v1118_v14  ;;  %v316_v48 = vld [vmem:[#allocation8 + $0x70] sm:$0xff]  ;;  %v317_v49 = vld [vmem:[#allocation8 + $0x78] sm:$0xff]  ;;  %v1160_v54 = vpack.c.bf16 %v397_v52, %v396_v51  ;;  %v400_v57 = vld [vmem:[#allocation11 + $0x20] sm:$0xff] }
  0xf8   :  { %1120 = vmatprep.subr.bf16.mxu0 %v1613_v0  ;;  %v1157_v50 = vpack.c.bf16 %v317_v49, %v316_v48  ;;  %v398_v53 = vld [vmem:[#allocation11 + $0x10] sm:$0xff]  ;;  %v399_v55 = vld [vmem:[#allocation11 + $0x18] sm:$0xff]  ;;  %v401_v58 = vld [vmem:[#allocation11 + $0x28] sm:$0xff] }
  0xf9   :  { %1143 = vmatpush3.bf16.msra.mxu1 %v1142_v24  ;;  %v1163_v56 = vpack.c.bf16 %v399_v55, %v398_v53  ;;  %v1166_v59 = vpack.c.bf16 %v401_v58, %v400_v57  ;;  %v402_v60 = vld [vmem:[#allocation11 + $0x30] sm:$0xff]  ;;  %v403_v61 = vld [vmem:[#allocation11 + $0x38] sm:$0xff]  ;;  %v404_v63 = vld [vmem:[#allocation11 + $0x40] sm:$0xff] }
  0xfa   :  { %1144 = vmatprep.subr.bf16.mxu1 %v1613_v0  ;;  %v1169_v62 = vpack.c.bf16 %v403_v61, %v402_v60  ;;  %v405_v2 = vld [vmem:[#allocation11 + $0x48] sm:$0xff]  ;;  %v406_v4 = vld [vmem:[#allocation11 + $0x50] sm:$0xff]  ;;  %v407_v5 = vld [vmem:[#allocation11 + $0x58] sm:$0xff] }
  0xfb   :  { %1122 = vmatpush3.bf16.msra.mxu0 %v1121_v21  ;;  %v1172_v3 = vpack.c.bf16 %v405_v2, %v404_v63  ;;  %v1175_v6 = vpack.c.bf16 %v407_v5, %v406_v4  ;;  %v408_v7 = vld [vmem:[#allocation11 + $0x60] sm:$0xff]  ;;  %v409_v8 = vld [vmem:[#allocation11 + $0x68] sm:$0xff]  ;;  %v410_v15 = vld [vmem:[#allocation11 + $0x70] sm:$0xff] }
  0xfc   :  { %1123 = vmatprep.subr.bf16.mxu0 %v1613_v0  ;;  %v1178_v9 = vpack.c.bf16 %v409_v8, %v408_v7  ;;  %v411_v16 = vld [vmem:[#allocation11 + $0x78] sm:$0xff]  ;;  %v490_v18 = vld [vmem:[#allocation14] sm:$0xff]  ;;  %v491_v19 = vld [vmem:[#allocation14 + $0x8] sm:$0xff] }
  0xfd   :  { %1146 = vmatpush3.bf16.msra.mxu1 %v1145_v30  ;;  %v1181_v17 = vpack.c.bf16 %v411_v16, %v410_v15  ;;  %v492_v20 = vld [vmem:[#allocation14 + $0x10] sm:$0xff]  ;;  %v1184_v21 = vpack.c.bf16 %v491_v19, %v490_v18  ;;  %v493_v22 = vld [vmem:[#allocation14 + $0x18] sm:$0xff]  ;;  %v494_v24 = vld [vmem:[#allocation14 + $0x20] sm:$0xff] }
  0xfe   :  { %1147 = vmatprep.subr.bf16.mxu1 %v1613_v0  ;;  %v1187_v23 = vpack.c.bf16 %v493_v22, %v492_v20  ;;  %v495_v25 = vld [vmem:[#allocation14 + $0x28] sm:$0xff]  ;;  %v497_v28 = vld [vmem:[#allocation14 + $0x38] sm:$0xff]  ;;  %v498_v30 = vld [vmem:[#allocation14 + $0x40] sm:$0xff] }
  0xff   :  { %1125 = vmatpush3.bf16.msra.mxu0 %v1124_v27  ;;  %v1190_v26 = vpack.c.bf16 %v495_v25, %v494_v24  ;;  %v496_v27 = vld [vmem:[#allocation14 + $0x30] sm:$0xff]  ;;  %v499_v31 = vld [vmem:[#allocation14 + $0x48] sm:$0xff]  ;;  %v501_v34 = vld [vmem:[#allocation14 + $0x58] sm:$0xff] }
 0x100   :  { %1126 = vmatprep.subr.bf16.mxu0 %v1613_v0  ;;  %v1193_v29 = vpack.c.bf16 %v497_v28, %v496_v27  ;;  %v1196_v32 = vpack.c.bf16 %v499_v31, %v498_v30  ;;  %v503_v37 = vld [vmem:[#allocation14 + $0x68] sm:$0xff]  ;;  %v504_v44 = vld [vmem:[#allocation14 + $0x70] sm:$0xff]  ;;  %v587_v51 = vld [vmem:[#allocation17 + $0x18] sm:$0xff] }
 0x101   :  { %1149 = vmatpush3.bf16.msra.mxu1 %v1148_v36  ;;  %v502_v36 = vld [vmem:[#allocation14 + $0x60] sm:$0xff]  ;;  %v585_v48 = vld [vmem:[#allocation17 + $0x8] sm:$0xff]  ;;  %v586_v49 = vld [vmem:[#allocation17 + $0x10] sm:$0xff] }
 0x102   :  { %1150 = vmatprep.subr.bf16.mxu1 %v1613_v0  ;;  %v1202_v38 = vpack.c.bf16 %v503_v37, %v502_v36  ;;  %v1211_v52 = vpack.c.bf16 %v587_v51, %v586_v49  ;;  %v588_v53 = vld [vmem:[#allocation17 + $0x20] sm:$0xff]  ;;  %v591_v57 = vld [vmem:[#allocation17 + $0x38] sm:$0xff]  ;;  %v593_v60 = vld [vmem:[#allocation17 + $0x48] sm:$0xff] }
 0x103   :  { %1128 = vmatpush3.bf16.msra.mxu0 %v1127_v33  ;;  %v500_v33 = vld [vmem:[#allocation14 + $0x50] sm:$0xff]  ;;  %v595_v63 = vld [vmem:[#allocation17 + $0x58] sm:$0xff]  ;;  %v682_v20 = vld [vmem:[#allocation20 + $0x20] sm:$0xff] }
 0x104   :  { %1129 = vmatprep.subr.bf16.mxu0 %v1613_v0  ;;  %v1199_v35 = vpack.c.bf16 %v501_v34, %v500_v33  ;;  %v597_v4 = vld [vmem:[#allocation17 + $0x68] sm:$0xff]  ;;  %v680_v16 = vld [vmem:[#allocation20 + $0x10] sm:$0xff]  ;;  %v681_v18 = vld [vmem:[#allocation20 + $0x18] sm:$0xff] }
 0x105   :  { %1152 = vmatpush3.bf16.msra.mxu1 %v1151_v42  ;;  %v679_v15 = vld [vmem:[#allocation20 + $0x8] sm:$0xff]  ;;  %v1235_v19 = vpack.c.bf16 %v681_v18, %v680_v16  ;;  %v686_v25 = vld [vmem:[#allocation20 + $0x40] sm:$0xff]  ;;  %v688_v28 = vld [vmem:[#allocation20 + $0x50] sm:$0xff] }
 0x106   :  { %1153 = vmatprep.subr.bf16.mxu1 %v1613_v0  ;;  %v690_v31 = vld [vmem:[#allocation20 + $0x60] sm:$0xff]  ;;  %v796_v34 = vld [vmem:[#allocation16] ss:$0 sm:$0xff] }
 0x107   :  { %1131 = vmatpush3.bf16.msra.mxu0 %v1130_v39  ;;  %v794_v39 = vld [vmem:[#allocation10] ss:$0 sm:$0xff] }
 0x108   :  { %1132 = vmatprep.subr.bf16.mxu0 %v1613_v0 }
 0x109   :  { %1155 = vmatpush3.bf16.msra.mxu1 %v1154_v46 }
 0x10a   :  { %1156 = vmatprep.subr.bf16.mxu1 %v1613_v0 }
 0x10b   :  { %1134 = vmatpush3.bf16.msra.mxu0 %v1133_v45  ;;  %v505_v45 = vld [vmem:[#allocation14 + $0x78] sm:$0xff] }
 0x10c   :  { %1159 = vmatprep.subr.bf16.mxu0 %v1613_v0  ;;  %v1205_v46 = vpack.c.bf16 %v505_v45, %v504_v44 }
 0x10d   :  { %1158 = vmatpush3.bf16.msra.mxu1 %v1157_v50 }
 0x10e   :  { %934 = vmatmul.mubr.f32.vlgmr.msra.gmra.mrb[0].mxu0 %v207_v47  ;;  %1183 = vmatprep.subr.bf16.mxu1 %v1613_v0  ;;  %v584_v47 = vld [vmem:[#allocation17] sm:$0xff] }
 0x10f   :  { %1003 = vmatprep.mubr.msk.f32.mxu0 %vm1614_vm0, %v1615_v1  ;;  %1161 = vmatpush3.bf16.msra.mxu0 %v1160_v54  ;;  %v1208_v50 = vpack.c.bf16 %v585_v48, %v584_v47  ;;  %v589_v54 = vld [vmem:[#allocation17 + $0x28] sm:$0xff]  ;;  %v798_v47 = vld [vmem:[#allocation22] ss:$0 sm:$0xff] }
 0x110   :  { %1162 = vmatprep.subr.bf16.mxu0 %v1613_v0  ;;  %v1214_v55 = vpack.c.bf16 %v589_v54, %v588_v53 }
 0x113   :  { %1164 = vmatpush3.bf16.msra.mxu0 %v1163_v56  ;;  %v590_v56 = vld [vmem:[#allocation17 + $0x30] sm:$0xff] }
 0x114   :  { %1165 = vmatprep.subr.bf16.mxu0 %v1613_v0  ;;  %v1217_v58 = vpack.c.bf16 %v591_v57, %v590_v56 }
 0x117   :  { %1167 = vmatpush3.bf16.msra.mxu0 %v1166_v59  ;;  %v592_v59 = vld [vmem:[#allocation17 + $0x40] sm:$0xff] }
 0x118   :  { %1168 = vmatprep.subr.bf16.mxu0 %v1613_v0  ;;  %v1220_v61 = vpack.c.bf16 %v593_v60, %v592_v59 }
 0x11b   :  { %1170 = vmatpush3.bf16.msra.mxu0 %v1169_v62  ;;  %v594_v62 = vld [vmem:[#allocation17 + $0x50] sm:$0xff] }
 0x11c   :  { %1171 = vmatprep.subr.bf16.mxu0 %v1613_v0  ;;  %v1223_v2 = vpack.c.bf16 %v595_v63, %v594_v62 }
 0x11f   :  { %1173 = vmatpush3.bf16.msra.mxu0 %v1172_v3  ;;  %v596_v3 = vld [vmem:[#allocation17 + $0x60] sm:$0xff] }
 0x120   :  { %1174 = vmatprep.subr.bf16.mxu0 %v1613_v0  ;;  %v1226_v5 = vpack.c.bf16 %v597_v4, %v596_v3 }
 0x123   :  { %1176 = vmatpush3.bf16.msra.mxu0 %v1175_v6  ;;  %v795_v6 = vld [vmem:[#allocation13] ss:$0 sm:$0xff] }
 0x124   :  { %1177 = vmatprep.subr.bf16.mxu0 %v1613_v0 }
 0x127   :  { %1179 = vmatpush3.bf16.msra.mxu0 %v1178_v9 }
 0x128   :  { %1180 = vmatprep.subr.bf16.mxu0 %v1613_v0 }
 0x12b   :  { %1182 = vmatpush3.bf16.msra.mxu0 %v1181_v17 }
 0x12c   :  { %1207 = vmatprep.subr.bf16.mxu0 %v1613_v0 }
 0x1e1   :  { %v297_v11 = vpop.f32.mrb[0].mxu0 }
 0x1e2   :  { %v298_v12 = vadd.f32 %v793_v10, %v297_v11  ;;  %v935_v13 = vpop.f32.mrb[1].mxu0  ;;  %v598_v11 = vld [vmem:[#allocation17 + $0x70] sm:$0xff] }
 0x1e4   :  { %v301_v14 = vmax.f32 %v298_v12, 0.0  ;;  %v599_v12 = vld [vmem:[#allocation17 + $0x78] sm:$0xff] }
 0x1e5   :  { %v1229_v13 = vpack.c.bf16 %v599_v12, %v598_v11 }
 0x1e6   :  { %969 = vmatmul.mubr.f32.vlgmr.msra.gmra.mrb[0].mxu1 %v301_v14  ;;  %v678_v14 = vld [vmem:[#allocation20] sm:$0xff] }
 0x1e7   :  { %1038 = vmatprep.mubr.msk.f32.mxu1 %vm1614_vm0, %v1615_v1  ;;  %1185 = vmatpush3.bf16.msra.mxu1 %v1184_v21  ;;  %v1232_v17 = vpack.c.bf16 %v679_v15, %v678_v14  ;;  %v683_v21 = vld [vmem:[#allocation20 + $0x28] sm:$0xff] }
 0x1e8   :  { %1186 = vmatprep.subr.bf16.mxu1 %v1613_v0  ;;  %v1238_v22 = vpack.c.bf16 %v683_v21, %v682_v20 }
 0x1eb   :  { %1188 = vmatpush3.bf16.msra.mxu1 %v1187_v23  ;;  %v685_v23 = vld [vmem:[#allocation20 + $0x38] sm:$0xff] }
 0x1ec   :  { %1189 = vmatprep.subr.bf16.mxu1 %v1613_v0 }
 0x1ef   :  { %1191 = vmatpush3.bf16.msra.mxu1 %v1190_v26  ;;  %v687_v26 = vld [vmem:[#allocation20 + $0x48] sm:$0xff] }
 0x1f0   :  { %1192 = vmatprep.subr.bf16.mxu1 %v1613_v0  ;;  %v1244_v27 = vpack.c.bf16 %v687_v26, %v686_v25 }
 0x1f3   :  { %1194 = vmatpush3.bf16.msra.mxu1 %v1193_v29  ;;  %v689_v29 = vld [vmem:[#allocation20 + $0x58] sm:$0xff] }
 0x1f4   :  { %1195 = vmatprep.subr.bf16.mxu1 %v1613_v0  ;;  %v1247_v30 = vpack.c.bf16 %v689_v29, %v688_v28 }
 0x1f7   :  { %1197 = vmatpush3.bf16.msra.mxu1 %v1196_v32  ;;  %v691_v32 = vld [vmem:[#allocation20 + $0x68] sm:$0xff] }
 0x1f8   :  { %1198 = vmatprep.subr.bf16.mxu1 %v1613_v0  ;;  %v1250_v33 = vpack.c.bf16 %v691_v32, %v690_v31 }
 0x1fb   :  { %1200 = vmatpush3.bf16.msra.mxu1 %v1199_v35 }
 0x1fc   :  { %1201 = vmatprep.subr.bf16.mxu1 %v1613_v0 }
 0x1ff   :  { %1203 = vmatpush3.bf16.msra.mxu1 %v1202_v38 }
 0x200   :  { %1204 = vmatprep.subr.bf16.mxu1 %v1613_v0 }
 0x203   :  { %1206 = vmatpush3.bf16.msra.mxu1 %v1205_v46 }
 0x204   :  { %1231 = vmatprep.subr.bf16.mxu1 %v1613_v0 }
 0x2b9   :  { %v391_v40 = vpop.f32.mrb[0].mxu1 }
 0x2ba   :  { %v392_v41 = vadd.f32 %v794_v39, %v391_v40  ;;  %v970_v42 = vpop.f32.mrb[1].mxu1  ;;  %v692_v39 = vld [vmem:[#allocation20 + $0x70] sm:$0xff]  ;;  %v693_v40 = vld [vmem:[#allocation20 + $0x78] sm:$0xff] }
 0x2bb   :  { %v797_v42 = vld [vmem:[#allocation19] ss:$0 sm:$0xff] }
 0x2bc   :  { %v395_v43 = vmax.f32 %v392_v41, 0.0  ;;  %v1253_v41 = vpack.c.bf16 %v693_v40, %v692_v39 }
 0x2be   :  { %1004 = vmatmul.mubr.f32.vlgmr.msra.gmra.mrb[2].mxu0 %v395_v43 }
 0x2bf   :  { %1073 = vmatprep.mubr.msk.f32.mxu0 %vm1614_vm0, %v1615_v1  ;;  %1209 = vmatpush3.bf16.msra.mxu0 %v1208_v50 }
 0x2c0   :  { %1210 = vmatprep.subr.bf16.mxu0 %v1613_v0 }
 0x2c3   :  { %1212 = vmatpush3.bf16.msra.mxu0 %v1211_v52 }
 0x2c4   :  { %1213 = vmatprep.subr.bf16.mxu0 %v1613_v0 }
 0x2c7   :  { %1215 = vmatpush3.bf16.msra.mxu0 %v1214_v55 }
 0x2c8   :  { %1216 = vmatprep.subr.bf16.mxu0 %v1613_v0 }
 0x2cb   :  { %1218 = vmatpush3.bf16.msra.mxu0 %v1217_v58 }
 0x2cc   :  { %1219 = vmatprep.subr.bf16.mxu0 %v1613_v0 }
 0x2cf   :  { %1221 = vmatpush3.bf16.msra.mxu0 %v1220_v61 }
 0x2d0   :  { %1222 = vmatprep.subr.bf16.mxu0 %v1613_v0 }
 0x2d3   :  { %1224 = vmatpush3.bf16.msra.mxu0 %v1223_v2 }
 0x2d4   :  { %1225 = vmatprep.subr.bf16.mxu0 %v1613_v0 }
 0x2d7   :  { %1227 = vmatpush3.bf16.msra.mxu0 %v1226_v5 }
 0x2d8   :  { %1228 = vmatprep.subr.bf16.mxu0 %v1613_v0 }
 0x2db   :  { %1230 = vmatpush3.bf16.msra.mxu0 %v1229_v13 }
 0x391   :  { %v485_v7 = vpop.f32.mrb[2].mxu0 }
 0x392   :  { %v486_v8 = vadd.f32 %v795_v6, %v485_v7  ;;  %v1005_v9 = vpop.f32.mrb[3].mxu0 }
 0x394   :  { %v489_v10 = vmax.f32 %v486_v8, 0.0 }
 0x396   :  { %1039 = vmatmul.mubr.f32.vlgmr.msra.gmra.mrb[2].mxu1 %v489_v10 }
 0x397   :  { %1108 = vmatprep.mubr.msk.f32.mxu1 %vm1614_vm0, %v1615_v1  ;;  %1233 = vmatpush3.bf16.msra.mxu1 %v1232_v17  ;;  %v684_v1 = vld [vmem:[#allocation20 + $0x30] sm:$0xff] }
 0x398   :  { %1234 = vmatprep.subr.bf16.mxu1 %v1613_v0  ;;  %v1241_v24 = vpack.c.bf16 %v685_v23, %v684_v1 }
 0x39b   :  { %1236 = vmatpush3.bf16.msra.mxu1 %v1235_v19 }
 0x39c   :  { %1237 = vmatprep.subr.bf16.mxu1 %v1613_v0 }
 0x39f   :  { %1239 = vmatpush3.bf16.msra.mxu1 %v1238_v22 }
 0x3a0   :  { %1240 = vmatprep.subr.bf16.mxu1 %v1613_v0 }
 0x3a3   :  { %1242 = vmatpush3.bf16.msra.mxu1 %v1241_v24 }
 0x3a4   :  { %1243 = vmatprep.subr.bf16.mxu1 %v1613_v0 }
 0x3a7   :  { %1245 = vmatpush3.bf16.msra.mxu1 %v1244_v27 }
 0x3a8   :  { %1246 = vmatprep.subr.bf16.mxu1 %v1613_v0 }
 0x3ab   :  { %1248 = vmatpush3.bf16.msra.mxu1 %v1247_v30 }
 0x3ac   :  { %1249 = vmatprep.subr.bf16.mxu1 %v1613_v0 }
 0x3af   :  { %1251 = vmatpush3.bf16.msra.mxu1 %v1250_v33 }
 0x3b0   :  { %1252 = vmatprep.subr.bf16.mxu1 %v1613_v0 }
 0x3b3   :  { %1254 = vmatpush3.bf16.msra.mxu1 %v1253_v41 }
 0x469   :  { %v579_v35 = vpop.f32.mrb[2].mxu1 }
 0x46a   :  { %v580_v36 = vadd.f32 %v796_v34, %v579_v35  ;;  %v1040_v37 = vpop.f32.mrb[3].mxu1 }
 0x46c   :  { %v583_v38 = vmax.f32 %v580_v36, 0.0 }
 0x46e   :  { %1074 = vmatmul.mubr.f32.vlgmr.msra.gmra.mrb[4].mxu0 %v583_v38 }
 0x541   :  { %v673_v43 = vpop.f32.mrb[4].mxu0 }
 0x542   :  { %v674_v44 = vadd.f32 %v797_v42, %v673_v43  ;;  %v1075_v45 = vpop.f32.mrb[5].mxu0 }
 0x544   :  { %v677_v46 = vmax.f32 %v674_v44, 0.0 }
 0x546   :  { %1109 = vmatmul.mubr.f32.vlgmr.msra.gmra.mrb[4].mxu1 %v677_v46 }
 0x619   :  { %v767_v0 = vpop.f32.mrb[4].mxu1 }
 0x61a   :  { %v768_v48 = vadd.f32 %v798_v47, %v767_v0  ;;  %v1110_v49 = vpop.f32.mrb[5].mxu1 }
 0x61c   :  { %771 = vst [vmem:[#allocation23] sm:$0xff] %v768_v48 }
 0x61d   :  { %1571 = shalt.err (!%p1568_p10)
}
 0x61e   :  { %s1572_s21 = scalar_lea.hbm %s1946_s13, 128 }
 0x61f   :  { %p1573_p11 = scmp.ne.s32.totalorder %s1946_s13, %s1572_s21  ;;  %p1576_p12 = scmp.lt.u32.totalorder %s1572_s21, %s1946_s13 }
 0x621   :  { %p1578_p13 = pnand %p1576_p12, %p1573_p11 }
 0x623   :  { %1581 = shalt.err (!%p1578_p13)
}
 0x624   :  { %781 = dma.vmem_to_hbm [thread:$0]  %s779_s18, 128, %s1946_s13, [#allocation4]  }
 0x625   :  { %1596 = dma.done.wait [#allocation4], 128  }
 0x626   :  { %1597 = vsyncadd [#allocation4], 4294967168 }
 0x627   :  { %785 = vsyncpa [#allocation3], 1 }
 0x628   :  { %786 = vsyncpa [#allocation6], 1 }
 0x629   :  { %787 = vsyncpa [#allocation9], 1 }
 0x62a   :  { %788 = vsyncpa [#allocation12], 1 }
 0x62b   :  { %789 = vsyncpa [#allocation15], 1 }
 0x62c   :  { %790 = vsyncpa [#allocation18], 1 }
 0x62d   :  { %791 = vsyncpa [#allocation21], 1 }
 0x62e   :  { %792 = vsyncpa [#allocation4], 1 }

</bundles_post_ra>
